<compile_context>
chip_gen: v6e
topology: v6e:2x2x1
jax: 0.10.0
libtpu: 0.0.40
codegen_flags: <defaults>
</compile_context>

<pallas_src>
import jax
import jax.numpy as jnp
from jax.experimental import pallas as pl
from jax.experimental.pallas import tpu as pltpu

# Fixed Sobel filters (same as the PyTorch module buffers).
#   SOBEL_X = [1,2,1]^T (vertical smooth)  x  [-1,0,1] (horizontal diff)
#   SOBEL_Y = [-1,0,1]^T (vertical diff)   x  [1,2,1]  (horizontal smooth)
SOBEL_X = ((-1.0, 0.0, 1.0),
           (-2.0, 0.0, 2.0),
           (-1.0, 0.0, 1.0))
SOBEL_Y = ((-1.0, -2.0, -1.0),
           ( 0.0,  0.0,  0.0),
           ( 1.0,  2.0,  1.0))


def _pick_block_channels(nc, h, w, target_bytes=2 << 20):
    """Largest divisor of nc whose f32 tile (B, H, W) stays under target_bytes."""
    per_ch = h * w * 4
    bmax = int(max(1, min(nc, target_bytes // max(per_ch, 1))))
    for b in range(bmax, 0, -1):
        if nc % b == 0:
            return b
    return 1


def _make_edge_loss_kernel(B, H, W):
    """Kernel over one tile of B channels; inputs (B, H, W), output (1, 1, W)."""

    def kernel(p_ref, t_ref, out_ref, dpad_ref):
        # Linearity: edge(pred) - edge(target) == edge(pred - target).
        d = p_ref[...].astype(jnp.float32) - t_ref[...].astype(jnp.float32)

        # Build the zero halo of F.conv2d(padding=1) in VMEM scratch.
        # (Zeroed every step so this is safe under megacore "parallel".)
        dpad_ref[...] = jnp.zeros_like(dpad_ref)
        dpad_ref[:, 1:H + 1, 1:W + 1] = d
        dp = dpad_ref[...]                              # (B, H+2, W+2)

        # Separable Sobel.  Vertical (sublane) pass, shared slices:
        top = dp[:, 0:H, :]
        mid = dp[:, 1:H + 1, :]
        bot = dp[:, 2:H + 2, :]
        v1 = top + 2.0 * mid + bot                      # [1,2,1]  -> for Sobel-x
        v2 = bot - top                                  # [-1,0,1] -> for Sobel-y

        # Horizontal (lane) pass:
        gx = v1[:, :, 2:W + 2] - v1[:, :, 0:W]          # [-1,0,1]
        gy = v2[:, :, 0:W] + 2.0 * v2[:, :, 1:W + 1] + v2[:, :, 2:W + 2]  # [1,2,1]

        sq = gx * gx + gy * gy                          # (B, H, W)

        # Per-tile partial sum, kept lane-resolved (reduce over B then H only).
        partial = jnp.sum(sq, axis=0, keepdims=True)    # (1, H, W)
        out_ref[...] = jnp.sum(partial, axis=1, keepdims=True)  # (1, 1, W)

    return kernel


def edge_txy_loss(pred, target):
    """JAX wrapper. pred/target: (N, C, H, W), NCHW like PyTorch."""
    assert pred.shape == target.shape
    N, C, H, W = pred.shape
    nc = N * C
    p = pred.reshape(nc, H, W)
    t = target.reshape(nc, H, W)

    B = _pick_block_channels(nc, H, W)
    nt = nc // B

    kernel = _make_edge_loss_kernel(B, H, W)

    partials = pl.pallas_call(
        kernel,
        out_shape=jax.ShapeDtypeStruct((nt, 1, W), jnp.float32),
        grid=(nt,),
        in_specs=[
            pl.BlockSpec((B, H, W), lambda i: (i, 0, 0)),
            pl.BlockSpec((B, H, W), lambda i: (i, 0, 0)),
        ],
        out_specs=pl.BlockSpec((1, 1, W), lambda i: (i, 0, 0)),
        scratch_shapes=[pltpu.VMEM((B, H + 2, W + 2), jnp.float32)],
        compiler_params=pltpu.CompilerParams(
            dimension_semantics=("parallel",)),
    )(p, t)

    # (MSE_x + MSE_y) / 2  ==  sum(gx^2 + gy^2) * 0.5 / (N*C*H*W)
    scale = 0.5 / float(N * C * H * W)
    return jnp.sum(partials) * scale


def _reference_edge_txy_loss(pred, target):
    """Pure-JAX reference (mirrors F.conv2d with groups=C) for validation."""
    N, C, H, W = pred.shape
    kx = jnp.asarray(SOBEL_X, jnp.float32).reshape(1, 1, 3, 3)
    ky = jnp.asarray(SOBEL_Y, jnp.float32).reshape(1, 1, 3, 3)
    kx = jnp.tile(kx, (C, 1, 1, 1))
    ky = jnp.tile(ky, (C, 1, 1, 1))
    dn = ("NCHW", "OIHW", "NCHW")

    def conv(x, k):
        return jax.lax.conv_general_dilated(
            x.astype(jnp.float32), k, window_strides=(1, 1),
            padding=((1, 1), (1, 1)), dimension_numbers=dn,
            feature_group_count=C)

    dx = conv(pred, kx) - conv(target, kx)
    dy = conv(pred, ky) - conv(target, ky)
    return (jnp.mean(dx * dx) + jnp.mean(dy * dy)) * 0.5


if __name__ == "__main__":
    key = jax.random.PRNGKey(0)
    k1, k2 = jax.random.split(key)
    N, C, H, W = 2, 4, 16, 16
    pred = jax.random.normal(k1, (N, C, H, W), jnp.float32)
    target = jax.random.normal(k2, (N, C, H, W), jnp.float32)

    loss = jax.block_until_ready(edge_txy_loss(pred, target))
    ref = jax.block_until_ready(_reference_edge_txy_loss(pred, target))

    assert jnp.allclose(loss, ref, rtol=1e-4, atol=1e-5), (loss, ref)
    print("KERNEL_OK")
</pallas_src>

<mosaic_0001>
module attributes {stable_mosaic.version = 11 : i64} {
  func.func @kernel(%arg0: i32, %arg1: memref<8x16x16xf32, #tpu.memory_space<vmem>>, %arg2: memref<8x16x16xf32, #tpu.memory_space<vmem>>, %arg3: memref<1x1x16xf32, #tpu.memory_space<vmem>>, %arg4: memref<8x18x18xf32, #tpu.memory_space<vmem>>) attributes {dimension_semantics = [#tpu.dimension_semantics<parallel>], iteration_bounds = array<i64: 1>, scalar_prefetch = 0 : i64, scratch_operands = 1 : i64, tpu.core_type = #tpu.core_type<tc>, window_params = [{transform_indices = @transform_0, window_bounds = array<i64: 8, 16, 16>}, {transform_indices = @transform_1, window_bounds = array<i64: 8, 16, 16>}, {transform_indices = @transform_2, window_bounds = array<i64: 1, 1, 16>}]} {
    %c0 = arith.constant 0 : index
    %c0_0 = arith.constant 0 : index
    %c0_1 = arith.constant 0 : index
    %0 = vector.load %arg1[%c0, %c0_0, %c0_1] : memref<8x16x16xf32, #tpu.memory_space<vmem>>, vector<8x16x16xf32>
    %c0_2 = arith.constant 0 : index
    %c0_3 = arith.constant 0 : index
    %c0_4 = arith.constant 0 : index
    %1 = vector.load %arg2[%c0_2, %c0_3, %c0_4] : memref<8x16x16xf32, #tpu.memory_space<vmem>>, vector<8x16x16xf32>
    %2 = arith.subf %0, %1 : vector<8x16x16xf32>
    %cst = arith.constant 0.000000e+00 : f32
    %3 = vector.broadcast %cst : f32 to vector<8x18x18xf32>
    %c0_5 = arith.constant 0 : index
    %c0_6 = arith.constant 0 : index
    %c0_7 = arith.constant 0 : index
    %4 = vector.load %arg4[%c0_5, %c0_6, %c0_7] : memref<8x18x18xf32, #tpu.memory_space<vmem>>, vector<8x18x18xf32>
    tpu.vector_store %arg4[%c0_5, %c0_6, %c0_7], %3 {strides = array<i32>} : memref<8x18x18xf32, #tpu.memory_space<vmem>>, vector<8x18x18xf32>,
    %c0_8 = arith.constant 0 : index
    %c1 = arith.constant 1 : index
    %c1_9 = arith.constant 1 : index
    %5 = vector.load %arg4[%c0_8, %c1, %c1_9] : memref<8x18x18xf32, #tpu.memory_space<vmem>>, vector<8x16x16xf32>
    tpu.vector_store %arg4[%c0_8, %c1, %c1_9], %2 {strides = array<i32>} : memref<8x18x18xf32, #tpu.memory_space<vmem>>, vector<8x16x16xf32>,
    %c0_10 = arith.constant 0 : index
    %c0_11 = arith.constant 0 : index
    %c0_12 = arith.constant 0 : index
    %6 = vector.load %arg4[%c0_10, %c0_11, %c0_12] : memref<8x18x18xf32, #tpu.memory_space<vmem>>, vector<8x18x18xf32>
    %7 = vector.extract_strided_slice %6 {offsets = [0, 0, 0], sizes = [8, 16, 18], strides = [1, 1, 1]} : vector<8x18x18xf32> to vector<8x16x18xf32>
    %8 = vector.extract_strided_slice %6 {offsets = [0, 1, 0], sizes = [8, 16, 18], strides = [1, 1, 1]} : vector<8x18x18xf32> to vector<8x16x18xf32>
    %9 = vector.extract_strided_slice %6 {offsets = [0, 2, 0], sizes = [8, 16, 18], strides = [1, 1, 1]} : vector<8x18x18xf32> to vector<8x16x18xf32>
    %cst_13 = arith.constant 2.000000e+00 : f32
    %10 = vector.broadcast %cst_13 : f32 to vector<8x16x18xf32>
    %11 = arith.mulf %10, %8 : vector<8x16x18xf32>
    %12 = arith.addf %7, %11 : vector<8x16x18xf32>
    %13 = arith.addf %12, %9 : vector<8x16x18xf32>
    %14 = arith.subf %9, %7 : vector<8x16x18xf32>
    %15 = vector.extract_strided_slice %13 {offsets = [0, 0, 2], sizes = [8, 16, 16], strides = [1, 1, 1]} : vector<8x16x18xf32> to vector<8x16x16xf32>
    %16 = vector.extract_strided_slice %13 {offsets = [0, 0, 0], sizes = [8, 16, 16], strides = [1, 1, 1]} : vector<8x16x18xf32> to vector<8x16x16xf32>
    %17 = arith.subf %15, %16 : vector<8x16x16xf32>
    %18 = vector.extract_strided_slice %14 {offsets = [0, 0, 0], sizes = [8, 16, 16], strides = [1, 1, 1]} : vector<8x16x18xf32> to vector<8x16x16xf32>
    %19 = vector.extract_strided_slice %14 {offsets = [0, 0, 1], sizes = [8, 16, 16], strides = [1, 1, 1]} : vector<8x16x18xf32> to vector<8x16x16xf32>
    %cst_14 = arith.constant 2.000000e+00 : f32
    %20 = vector.broadcast %cst_14 : f32 to vector<8x16x16xf32>
    %21 = arith.mulf %20, %19 : vector<8x16x16xf32>
    %22 = arith.addf %18, %21 : vector<8x16x16xf32>
    %23 = vector.extract_strided_slice %14 {offsets = [0, 0, 2], sizes = [8, 16, 16], strides = [1, 1, 1]} : vector<8x16x18xf32> to vector<8x16x16xf32>
    %24 = arith.addf %22, %23 : vector<8x16x16xf32>
    %25 = arith.mulf %17, %17 : vector<8x16x16xf32>
    %26 = arith.mulf %24, %24 : vector<8x16x16xf32>
    %27 = arith.addf %25, %26 : vector<8x16x16xf32>
    %cst_15 = arith.constant dense<0.000000e+00> : vector<16x16xf32>
    %28 = vector.multi_reduction <add>, %27, %cst_15 [0] : vector<8x16x16xf32> to vector<16x16xf32>
    %29 = vector.shape_cast %28 : vector<16x16xf32> to vector<1x16x16xf32>
    %cst_16 = arith.constant dense<0.000000e+00> : vector<1x16xf32>
    %30 = vector.multi_reduction <add>, %29, %cst_16 [1] : vector<1x16x16xf32> to vector<1x16xf32>
    %31 = vector.shape_cast %30 : vector<1x16xf32> to vector<1x1x16xf32>
    %c0_17 = arith.constant 0 : index
    %c0_18 = arith.constant 0 : index
    %c0_19 = arith.constant 0 : index
    %32 = vector.load %arg3[%c0_17, %c0_18, %c0_19] : memref<1x1x16xf32, #tpu.memory_space<vmem>>, vector<1x1x16xf32>
    tpu.vector_store %arg3[%c0_17, %c0_18, %c0_19], %31 {strides = array<i32>} : memref<1x1x16xf32, #tpu.memory_space<vmem>>, vector<1x1x16xf32>,
    return
  }
  func.func @transform_0(%arg0: i32) -> (i32, i32, i32) {
    %c0_i32 = arith.constant 0 : i32
    %c0_i32_0 = arith.constant 0 : i32
    %c0_i32_1 = arith.constant 0 : i32
    return %arg0, %c0_i32, %c0_i32_0 : i32, i32, i32
  }
  func.func @transform_1(%arg0: i32) -> (i32, i32, i32) {
    %c0_i32 = arith.constant 0 : i32
    %c0_i32_0 = arith.constant 0 : i32
    %c0_i32_1 = arith.constant 0 : i32
    return %arg0, %c0_i32, %c0_i32_0 : i32, i32, i32
  }
  func.func @transform_2(%arg0: i32) -> (i32, i32, i32) {
    %c0_i32 = arith.constant 0 : i32
    %c0_i32_0 = arith.constant 0 : i32
    %c0_i32_1 = arith.constant 0 : i32
    return %arg0, %c0_i32, %c0_i32_0 : i32, i32, i32
  }
}

</mosaic_0001>

<bundles_post_ra>
// kernel: tpu_custom_call.1
= control target key start
LH: loop header
LB: loop body
LE: loop exit
PB: predicated region body
PF: predicated region fallthrough
CT: control target
= control target key end

     0   :  { %7 = vsyncpa [#allocation4], 0  ;;  %s1819_s0 = inlined_call_operand.hbm [shape: f32[8,16,16], index: 0, kind: input, shape index: {}]   ;;  %s1820_s1 = inlined_call_operand.hbm [shape: f32[8,16,16], index: 1, kind: input, shape index: {}]   ;;  %s1821_s2 = inlined_call_operand.hbm [shape: f32[1,1,16], index: 2, kind: output, shape index: {}]  }
   0x1   :  { %8 = vsyncpa [#allocation7], 0 }
   0x2   :  { %9 = vsyncpa [#allocation5], 0  ;;  %s1160_s9 = smov [#allocation3]  }
   0x3   :  { %s15_s10 = sshll.u32 %s1160_s9, 4  ;;  %s16_s10 = int_to_ptr.vmem [resolvable:$true] %s15_s10 }
   0x4   :  { %s1102_s11 = scalar_lea.vmem %s16_s10, 2048  ;;  %p1107_p1 = scmp.lt.s32.totalorder %s16_s10, %s16_s10 }
   0x5   :  { %p1103_p0 = scmp.ne.s32.totalorder %s16_s10, %s1102_s11  ;;  %p1108_p2 = scmp.lt.s32.totalorder %s1102_s11, %s1102_s11 }
   0x7   :  { %p1109_p3 = por %p1108_p2, %p1107_p1 }
   0x9   :  { %p1110_p4 = pnand %p1109_p3, %p1103_p0 }
   0xb   :  { %1113 = shalt.err (!%p1110_p4)
}
   0xc   :  { %s1161_s12 = smov 128   ;;  %s1162_s13 = smov 8  }
   0xd   :  { %21 = dma.hbm_to_vmem [thread:$0]  %s1819_s0, 2048, %s16_s10, [#allocation4], %s1161_s12, %s1161_s12, %s1162_s13  }
   0xe   :  { %s1163_s16 = smov [#allocation6]  }
   0xf   :  { %s27_s17 = sshll.u32 %s1163_s16, 4  ;;  %s28_s17 = int_to_ptr.vmem [resolvable:$true] %s27_s17 }
  0x10   :  { %s1122_s18 = scalar_lea.vmem %s28_s17, 2048  ;;  %p1127_p6 = scmp.lt.s32.totalorder %s28_s17, %s28_s17 }
  0x11   :  { %p1123_p5 = scmp.ne.s32.totalorder %s28_s17, %s1122_s18  ;;  %p1128_p7 = scmp.lt.s32.totalorder %s1122_s18, %s1122_s18 }
  0x13   :  { %p1129_p8 = por %p1128_p7, %p1127_p6 }
  0x15   :  { %p1130_p9 = pnand %p1129_p8, %p1123_p5 }
  0x17   :  { %1133 = shalt.err (!%p1130_p9)
}
  0x18   :  { %33 = dma.hbm_to_vmem [thread:$0]  %s1820_s1, 2048, %s28_s17, [#allocation7], %s1161_s12, %s1161_s12, %s1162_s13  }
  0x19   :  { %1154 = dma.done.wait [#allocation4], 2048  }
  0x1a   :  { %1155 = vsyncadd [#allocation4], 4294965248 }
  0x1b   :  { %1156 = dma.done.wait [#allocation7], 2048  }
  0x1c   :  { %1157 = vsyncadd [#allocation7], 4294965248  ;;  %vm88_vm0 = vcmask 146432   ;;  %v1164_v0 = vmov 0.0   ;;  %vm91_vm1 = vcmask 140288   ;;  %v42_v1 = vld [vmem:[#allocation3 + $0x10] sm:$0xff] }
  0x1d   :  { %93 = vst.msk [vmem:[#allocation2 + $0x18] sm:$0xff] %vm88_vm0, %v1164_v0  ;;  %94 = vst.msk [vmem:[#allocation2 + $0x20] sm:$0xff] %vm88_vm0, %v1164_v0  ;;  %v58_v2 = vld [vmem:[#allocation6 + $0x10] sm:$0xff]  ;;  %v40_v3 = vld [vmem:[#allocation3] sm:$0xff]  ;;  %s1165_s0 = smov 1   ;;  %vm178_vm2 = vcmask 138248  }
  0x1e   :  { %89 = vst.msk [vmem:[#allocation2] sm:$0xff] %vm88_vm0, %v1164_v0  ;;  %90 = vst.msk [vmem:[#allocation2 + $0x8] sm:$0xff] %vm88_vm0, %v1164_v0  ;;  %v74_v4 = vsub.f32 %v42_v1, %v58_v2  ;;  %v56_v5 = vld [vmem:[#allocation6] sm:$0xff]  ;;  %v43_v6 = vld [vmem:[#allocation3 + $0x18] sm:$0xff]  ;;  %s1166_s1 = smov 126   ;;  %vm437_vm3 = vcmask 1041408  }
  0x1f   :  { %96 = vst.msk [vmem:[#allocation2 + $0x30] sm:$0xff] %vm88_vm0, %v1164_v0  ;;  %97 = vst.msk [vmem:[#allocation2 + $0x38] sm:$0xff] %vm88_vm0, %v1164_v0  ;;  %v59_v7 = vld [vmem:[#allocation6 + $0x18] sm:$0xff]  ;;  %v72_v8 = vsub.f32 %v40_v3, %v56_v5  ;;  %v41_v9 = vld [vmem:[#allocation3 + $0x8] sm:$0xff]  ;;  %vm267_vm4 = vcmask 1046528   ;;  %vm364_vm5 = vcmask 1045504  }
  0x20   :  { %99 = vst.msk [vmem:[#allocation2 + $0x48] sm:$0xff] %vm88_vm0, %v1164_v0  ;;  %100 = vst.msk [vmem:[#allocation2 + $0x50] sm:$0xff] %vm88_vm0, %v1164_v0  ;;  %v57_v10 = vld [vmem:[#allocation6 + $0x8] sm:$0xff]  ;;  %134 = vrot.lane.b32.xlu1 %v74_v4, %s1165_s0  ;;  %v75_v11 = vsub.f32 %v43_v6, %v59_v7  ;;  %v44_v15 = vld [vmem:[#allocation3 + $0x20] sm:$0xff]  ;;  %s1167_s21 = smov 127   ;;  %s1168_s22 = smov 2  }
  0x21   :  { %102 = vst.msk [vmem:[#allocation2 + $0x60] sm:$0xff] %vm88_vm0, %v1164_v0  ;;  %103 = vst.msk [vmem:[#allocation2 + $0x68] sm:$0xff] %vm88_vm0, %v1164_v0  ;;  %130 = vrot.lane.b32.xlu0 %v72_v8, %s1165_s0  ;;  %v73_v12 = vsub.f32 %v41_v9, %v57_v10  ;;  %v45_v13 = vld [vmem:[#allocation3 + $0x28] sm:$0xff]  ;;  %v60_v16 = vld [vmem:[#allocation6 + $0x20] sm:$0xff]  ;;  %vm1022_vm6 = vcmask 146448   ;;  %s1169_s23 = smov [#allocation8]  }
  0x22   :  { %105 = vst.msk [vmem:[#allocation2 + $0x78] sm:$0xff] %vm88_vm0, %v1164_v0  ;;  %106 = vst.msk [vmem:[#allocation2 + $0x80] sm:$0xff] %vm88_vm0, %v1164_v0  ;;  %v61_v14 = vld [vmem:[#allocation6 + $0x28] sm:$0xff]  ;;  %v76_v18 = vsub.f32 %v44_v15, %v60_v16  ;;  %v47_v19 = vld [vmem:[#allocation3 + $0x38] sm:$0xff]  ;;  %s1074_s24 = sshll.u32 %s1169_s23, 4  ;;  %vm1066_vm7 = vcmask 122880   ;;  %s1075_s24 = int_to_ptr.vmem [resolvable:$true] %s1074_s24 }
  0x23   :  { %108 = vst.msk [vmem:[#allocation2 + $0x90] sm:$0xff] %vm88_vm0, %v1164_v0  ;;  %109 = vst.msk [vmem:[#allocation2 + $0x98] sm:$0xff] %vm88_vm0, %v1164_v0  ;;  %v77_v17 = vsub.f32 %v45_v13, %v61_v14  ;;  %v63_v20 = vld [vmem:[#allocation6 + $0x38] sm:$0xff]  ;;  %v46_v21 = vld [vmem:[#allocation3 + $0x30] sm:$0xff]  ;;  %s1134_s25 = scalar_lea.vmem %s1075_s24, 16  ;;  %s1138_s26 = scalar_lea.vmem %s1075_s24, 32 }
  0x24   :  { %111 = vst.msk [vmem:[#allocation2 + $0xa8] sm:$0xff] %vm88_vm0, %v1164_v0  ;;  %112 = vst.msk [vmem:[#allocation2 + $0xb0] sm:$0xff] %vm88_vm0, %v1164_v0  ;;  %136 = vrot.lane.b32.xlu1 %v75_v11, %s1165_s0  ;;  %v62_v22 = vld [vmem:[#allocation6 + $0x30] sm:$0xff]  ;;  %v79_v23 = vsub.f32 %v47_v19, %v63_v20  ;;  %v49_v25 = vld [vmem:[#allocation3 + $0x48] sm:$0xff]  ;;  %p1135_p10 = scmp.ne.s32.totalorder %s1075_s24, %s1134_s25  ;;  %p1139_p11 = scmp.lt.s32.totalorder %s1075_s24, %s1075_s24 }
  0x25   :  { %95 = vst.msk [vmem:[#allocation2 + $0x28] sm:$0x3] %vm91_vm1, %v1164_v0  ;;  %92 = vst.msk [vmem:[#allocation2 + $0x10] sm:$0x3] %vm91_vm1, %v1164_v0  ;;  %132 = vrot.lane.b32.xlu0 %v73_v12, %s1165_s0  ;;  %v78_v24 = vsub.f32 %v46_v21, %v62_v22  ;;  %v65_v26 = vld [vmem:[#allocation6 + $0x48] sm:$0xff]  ;;  %v48_v27 = vld [vmem:[#allocation3 + $0x40] sm:$0xff]  ;;  %p1140_p12 = scmp.lt.s32.totalorder %s1138_s26, %s1134_s25 }
  0x26   :  { %98 = vst.msk [vmem:[#allocation2 + $0x40] sm:$0x3] %vm91_vm1, %v1164_v0  ;;  %101 = vst.msk [vmem:[#allocation2 + $0x58] sm:$0x3] %vm91_vm1, %v1164_v0  ;;  %v64_v28 = vld [vmem:[#allocation6 + $0x40] sm:$0xff]  ;;  %v81_v29 = vsub.f32 %v49_v25, %v65_v26  ;;  %v51_v31 = vld [vmem:[#allocation3 + $0x58] sm:$0xff] }
  0x27   :  { %104 = vst.msk [vmem:[#allocation2 + $0x70] sm:$0x3] %vm91_vm1, %v1164_v0  ;;  %107 = vst.msk [vmem:[#allocation2 + $0x88] sm:$0x3] %vm91_vm1, %v1164_v0  ;;  %v80_v30 = vsub.f32 %v48_v27, %v64_v28  ;;  %v67_v32 = vld [vmem:[#allocation6 + $0x58] sm:$0xff]  ;;  %v50_v33 = vld [vmem:[#allocation3 + $0x50] sm:$0xff]  ;;  %p1141_p13 = por %p1140_p12, %p1139_p11 }
  0x28   :  { %110 = vst.msk [vmem:[#allocation2 + $0xa0] sm:$0x3] %vm91_vm1, %v1164_v0  ;;  %113 = vst.msk [vmem:[#allocation2 + $0xb8] sm:$0x3] %vm91_vm1, %v1164_v0  ;;  %140 = vrot.lane.b32.xlu1 %v77_v17, %s1165_s0  ;;  %v66_v34 = vld [vmem:[#allocation6 + $0x50] sm:$0xff]  ;;  %v83_v35 = vsub.f32 %v51_v31, %v67_v32  ;;  %v53_v37 = vld [vmem:[#allocation3 + $0x68] sm:$0xff] }
  0x29   :  { %138 = vrot.lane.b32.xlu0 %v76_v18, %s1165_s0  ;;  %v82_v36 = vsub.f32 %v50_v33, %v66_v34  ;;  %v69_v38 = vld [vmem:[#allocation6 + $0x68] sm:$0xff]  ;;  %v52_v39 = vld [vmem:[#allocation3 + $0x60] sm:$0xff]  ;;  %v55_v43 = vld [vmem:[#allocation3 + $0x78] sm:$0xff]  ;;  %p1142_p0 = pnand %p1141_p13, %p1135_p10 }
  0x2a   :  { %v68_v40 = vld [vmem:[#allocation6 + $0x60] sm:$0xff]  ;;  %v85_v41 = vsub.f32 %v53_v37, %v69_v38  ;;  %v71_v44 = vld [vmem:[#allocation6 + $0x78] sm:$0xff]  ;;  %v54_v45 = vld [vmem:[#allocation3 + $0x70] sm:$0xff] }
  0x2b   :  { %v84_v42 = vsub.f32 %v52_v39, %v68_v40  ;;  %v70_v46 = vld [vmem:[#allocation6 + $0x70] sm:$0xff]  ;;  %v87_v47 = vsub.f32 %v55_v43, %v71_v44 }
  0x2c   :  { %144 = vrot.lane.b32.xlu1 %v79_v23, %s1165_s0  ;;  %v86_v48 = vsub.f32 %v54_v45, %v70_v46 }
  0x2d   :  { %142 = vrot.lane.b32.xlu0 %v78_v24, %s1165_s0 }
  0x30   :  { %148 = vrot.lane.b32.xlu1 %v81_v29, %s1165_s0 }
  0x31   :  { %146 = vrot.lane.b32.xlu0 %v80_v30, %s1165_s0 }
  0x34   :  { %152 = vrot.lane.b32.xlu1 %v83_v35, %s1165_s0 }
  0x35   :  { %150 = vrot.lane.b32.xlu0 %v82_v36, %s1165_s0 }
  0x38   :  { %156 = vrot.lane.b32.xlu1 %v85_v41, %s1165_s0 }
  0x39   :  { %154 = vrot.lane.b32.xlu0 %v84_v42, %s1165_s0 }
  0x3c   :  { %160 = vrot.lane.b32.xlu1 %v87_v47, %s1165_s0 }
  0x3d   :  { %158 = vrot.lane.b32.xlu0 %v86_v48, %s1165_s0 }
  0x92   :  { %v135_v49 = vpop.permute.xlu1 %134 }
  0x93   :  { %181 = vst.msk [vmem:[#allocation2 + $0x19] sm:$0xff] %vm178_vm2, %v135_v49  ;;  %v131_v50 = vpop.permute.xlu0 %130 }
  0x94   :  { %179 = vst.msk [vmem:[#allocation2 + $0x1] sm:$0xff] %vm178_vm2, %v131_v50 }
  0x96   :  { %v137_v51 = vpop.permute.xlu1 %136 }
  0x97   :  { %182 = vst.msk [vmem:[#allocation2 + $0x21] sm:$0xff] %vm178_vm2, %v137_v51  ;;  %v133_v52 = vpop.permute.xlu0 %132 }
  0x98   :  { %180 = vst.msk [vmem:[#allocation2 + $0x9] sm:$0xff] %vm178_vm2, %v133_v52 }
  0x9a   :  { %v141_v53 = vpop.permute.xlu1 %140  ;;  %v1227_v54 = vld [vmem:[#allocation2 + $0x18] sm:$0xff] }
  0x9b   :  { %184 = vst.msk [vmem:[#allocation2 + $0x39] sm:$0xff] %vm178_vm2, %v141_v53  ;;  %v139_v55 = vpop.permute.xlu0 %138  ;;  %v441_v56 = vrot.slane %v1227_v54, 6  ;;  %v1231_v57 = vld [vmem:[#allocation2] sm:$0xff]  ;;  %v222_v38 = vmul.f32 2.0, %v1227_v54 }
  0x9c   :  { %183 = vst.msk [vmem:[#allocation2 + $0x31] sm:$0xff] %vm178_vm2, %v139_v55  ;;  %v438_v58 = vrot.slane %v1231_v57, 6  ;;  %v219_v15 = vmul.f32 2.0, %v1231_v57  ;;  %v365_v47 = vrot.slane %v1231_v57, 2 }
  0x9d   :  { %v1236_v59 = vsub.f32 %v1227_v54, %v441_v56 }
  0x9e   :  { %v145_v60 = vpop.permute.xlu1 %144  ;;  %v1241_v61 = vsub.f32 %v1231_v57, %v438_v58  ;;  %v1243_v62 = vld [vmem:[#allocation2 + $0x20] sm:$0xff]  ;;  %v1254_v3 = vld [vmem:[#allocation2 + $0x28] sm:$0x3]  ;;  %v268_v33 = vrot.slane %v219_v15, 1 }
  0x9f   :  { %186 = vst.msk [vmem:[#allocation2 + $0x51] sm:$0xff] %vm178_vm2, %v145_v60  ;;  %v143_v63 = vpop.permute.xlu0 %142  ;;  %764 = vrot.lane.b32.xlu0 %v1236_v59, %s1166_s1  ;;  %v442_v0 = vrot.slane %v1243_v62, 6  ;;  %v1249_v1 = vld [vmem:[#allocation2 + $0x8] sm:$0xff]  ;;  %v197_v2 = vld [vmem:[#allocation2 + $0x10] sm:$0x3]  ;;  %v224_v39 = vmul.f32 2.0, %v1254_v3 }
  0xa0   :  { %185 = vst.msk [vmem:[#allocation2 + $0x49] sm:$0xff] %vm178_vm2, %v143_v63  ;;  %758 = vrot.lane.b32.xlu1 %v1241_v61, %s1166_s1  ;;  %v439_v4 = vrot.slane %v1249_v1, 6  ;;  %v221_v6 = vmul.f32 2.0, %v197_v2  ;;  %v368_v17 = vrot.slane %v197_v2, 2  ;;  %v220_v18 = vmul.f32 2.0, %v1249_v1 }
  0xa1   :  { %v1258_v5 = vsub.f32 %v1254_v3, %v442_v0  ;;  %v443_v10 = vsel %vm437_vm3, %v441_v56, %v442_v0  ;;  %v366_v19 = vrot.slane %v1249_v1, 2  ;;  %v223_v50 = vmul.f32 2.0, %v1243_v62 }
  0xa2   :  { %v149_v7 = vpop.permute.xlu1 %148  ;;  %v1262_v8 = vsub.f32 %v197_v2, %v439_v4  ;;  %v271_v16 = vrot.slane %v221_v6, 1  ;;  %v1281_v21 = vsub.f32 %v1243_v62, %v443_v10  ;;  %v269_v27 = vrot.slane %v220_v18, 1  ;;  %v1299_v30 = vld [vmem:[#allocation2 + $0x40] sm:$0x3] }
  0xa3   :  { %188 = vst.msk [vmem:[#allocation2 + $0x69] sm:$0xff] %vm178_vm2, %v149_v7  ;;  %v147_v9 = vpop.permute.xlu0 %146  ;;  %768 = vrot.lane.b32.xlu0 %v1258_v5, %s1166_s1  ;;  %v1268_v11 = vld [vmem:[#allocation2 + $0x30] sm:$0xff]  ;;  %v1270_v12 = vld [vmem:[#allocation2 + $0x38] sm:$0xff]  ;;  %v369_v32 = vsel %vm364_vm5, %v366_v19, %v368_v17  ;;  %v367_v55 = vsel %vm364_vm5, %v365_v47, %v366_v19  ;;  %v273_v56 = vrot.slane %v222_v38, 1  ;;  %v276_v60 = vrot.slane %v224_v39, 1 }
  0xa4   :  { %187 = vst.msk [vmem:[#allocation2 + $0x61] sm:$0xff] %vm178_vm2, %v147_v9  ;;  %762 = vrot.lane.b32.xlu1 %v1262_v8, %s1166_s1  ;;  %v444_v13 = vrot.slane %v1268_v11, 6  ;;  %v445_v14 = vrot.slane %v1270_v12, 6  ;;  %v272_v31 = vsel %vm267_vm4, %v269_v27, %v271_v16  ;;  %v270_v44 = vsel %vm267_vm4, %v268_v33, %v269_v27 }
  0xa5   :  { %v325_v37 = vadd.f32 %v272_v31, %v1249_v1  ;;  %v324_v49 = vadd.f32 %v270_v44, %v1231_v57  ;;  %v373_v63 = vrot.slane %v1254_v3, 2  ;;  %v274_v15 = vrot.slane %v223_v50, 1 }
  0xa6   :  { %v153_v20 = vpop.permute.xlu1 %152  ;;  %v1284_v22 = vsub.f32 %v1268_v11, %v444_v13  ;;  %v446_v24 = vsel %vm437_vm3, %v444_v13, %v445_v14  ;;  %v1304_v34 = vsub.f32 %v1299_v30, %v445_v14  ;;  %v227_v13 = vmul.f32 2.0, %v1299_v30  ;;  %v1357_v14 = vld [vmem:[#allocation2 + $0x58] sm:$0x3] }
  0xa7   :  { %190 = vst.msk [vmem:[#allocation2 + $0x81] sm:$0xff] %vm178_vm2, %v153_v20  ;;  %v151_v23 = vpop.permute.xlu0 %150  ;;  %v1288_v25 = vld [vmem:[#allocation2 + $0x48] sm:$0xff]  ;;  %v1290_v26 = vld [vmem:[#allocation2 + $0x50] sm:$0xff]  ;;  %v1307_v35 = vsub.f32 %v1270_v12, %v446_v24  ;;  %v1327_v48 = vadd.f32 %v369_v32, %v325_v37  ;;  %v1347_v9 = vadd.f32 %v367_v55, %v324_v49  ;;  %v371_v16 = vrot.slane %v1243_v62, 2 }
  0xa8   :  { %189 = vst.msk [vmem:[#allocation2 + $0x79] sm:$0xff] %vm178_vm2, %v151_v23  ;;  %766 = vrot.lane.b32.xlu1 %v1281_v21, %s1166_s1  ;;  %770 = vrot.lane.b32.xlu0 %v1284_v22, %s1166_s1  ;;  %v447_v28 = vrot.slane %v1288_v25, 6  ;;  %v448_v29 = vrot.slane %v1290_v26, 6  ;;  %v370_v17 = vrot.slane %v1227_v54, 2  ;;  %v226_v20 = vmul.f32 2.0, %v1270_v12 }
  0xa9   :  { %1842 = vst [vmem:[#allocation12_spill] sm:$0xff] %v1327_v48  ;;  %1843 = vst [vmem:[#allocation13_spill] sm:$0xff] %v1347_v9  ;;  %v277_v27 = vsel %vm267_vm4, %v274_v15, %v276_v60  ;;  %v275_v31 = vsel %vm267_vm4, %v273_v56, %v274_v15  ;;  %v378_v32 = vrot.slane %v1299_v30, 2  ;;  %v593_v33 = vmul.f32 2.0, %v1236_v59 }
  0xaa   :  { %v157_v36 = vpop.permute.xlu1 %156  ;;  %v449_v40 = vsel %vm437_vm3, %v447_v28, %v448_v29  ;;  %v1332_v51 = vsub.f32 %v1288_v25, %v447_v28  ;;  %v1362_v18 = vsub.f32 %v1357_v14, %v448_v29  ;;  %v1369_v24 = vld [vmem:[#allocation2 + $0x70] sm:$0x3]  ;;  %v374_v28 = vsel %vm364_vm5, %v371_v16, %v373_v63 }
  0xab   :  { %v1313_v41 = vld [vmem:[#allocation2 + $0x60] sm:$0xff]  ;;  %v1315_v42 = vld [vmem:[#allocation2 + $0x68] sm:$0xff]  ;;  %v155_v43 = vpop.permute.xlu0 %154  ;;  %192 = vst.msk [vmem:[#allocation2 + $0x99] sm:$0xff] %vm178_vm2, %v157_v36  ;;  %v1335_v52 = vsub.f32 %v1290_v26, %v449_v40  ;;  %v230_v29 = vmul.f32 2.0, %v1357_v14  ;;  %v595_v36 = vmul.f32 2.0, %v1258_v5  ;;  %v281_v38 = vrot.slane %v227_v13, 1 }
  0xac   :  { %774 = vrot.lane.b32.xlu0 %v1304_v34, %s1166_s1  ;;  %772 = vrot.lane.b32.xlu1 %v1307_v35, %s1166_s1  ;;  %v450_v45 = vrot.slane %v1313_v41, 6  ;;  %v451_v46 = vrot.slane %v1315_v42, 6  ;;  %191 = vst.msk [vmem:[#allocation2 + $0x91] sm:$0xff] %vm178_vm2, %v155_v43  ;;  %v327_v39 = vadd.f32 %v277_v27, %v1243_v62  ;;  %v326_v40 = vadd.f32 %v275_v31, %v1227_v54 }
  0xad   :  { %v372_v30 = vsel %vm364_vm5, %v370_v17, %v371_v16  ;;  %v233_v47 = vmul.f32 2.0, %v1369_v24  ;;  %v279_v50 = vrot.slane %v226_v20, 1  ;;  %v376_v54 = vrot.slane %v1270_v12, 2 }
  0xae   :  { %v161_v53 = vpop.permute.xlu1 %160  ;;  %v452_v0 = vsel %vm437_vm3, %v450_v45, %v451_v46  ;;  %v1382_v37 = vld [vmem:[#allocation2 + $0x88] sm:$0x3]  ;;  %v1388_v43 = vsub.f32 %v1313_v41, %v450_v45  ;;  %v1399_v55 = vadd.f32 %v374_v28, %v327_v39  ;;  %v1401_v62 = vadd.f32 %v372_v30, %v326_v40 }
  0xaf   :  { %v1342_v2 = vld [vmem:[#allocation2 + $0x78] sm:$0xff]  ;;  %v1344_v6 = vld [vmem:[#allocation2 + $0x80] sm:$0xff]  ;;  %194 = vst.msk [vmem:[#allocation2 + $0xb1] sm:$0xff] %vm178_vm2, %v161_v53  ;;  %v159_v7 = vpop.permute.xlu0 %158  ;;  %v1365_v19 = vsub.f32 %v1315_v42, %v452_v0  ;;  %v1397_v53 = vmul.f32 2.0, %v1382_v37  ;;  %v286_v56 = vrot.slane %v230_v29, 1  ;;  %v383_v45 = vrot.slane %v1357_v14, 2 }
  0xb0   :  { %776 = vrot.lane.b32.xlu0 %v1332_v51, %s1166_s1  ;;  %778 = vrot.lane.b32.xlu1 %v1335_v52, %s1166_s1  ;;  %v453_v3 = vrot.slane %v1342_v2, 6  ;;  %v454_v10 = vrot.slane %v1344_v6, 6  ;;  %193 = vst.msk [vmem:[#allocation2 + $0xa9] sm:$0xff] %vm178_vm2, %v159_v7  ;;  %1844 = vst [vmem:[#allocation14_spill] sm:$0xff] %v1399_v55  ;;  %v388_v60 = vrot.slane %v1369_v24, 2  ;;  %v599_v63 = vmul.f32 2.0, %v1332_v51 }
  0xb1   :  { %1845 = vst [vmem:[#allocation15_spill] sm:$0xff] %v1401_v62  ;;  %v282_v7 = vsel %vm267_vm4, %v279_v50, %v281_v38  ;;  %v379_v13 = vsel %vm364_vm5, %v376_v54, %v378_v32  ;;  %v225_v15 = vmul.f32 2.0, %v1268_v11  ;;  %v291_v16 = vrot.slane %v233_v47, 1 }
  0xb2   :  { %v455_v23 = vsel %vm437_vm3, %v453_v3, %v454_v10  ;;  %v1418_v14 = vsub.f32 %v1369_v24, %v451_v46  ;;  %v393_v17 = vrot.slane %v1382_v37, 2  ;;  %v329_v20 = vadd.f32 %v282_v7, %v1270_v12 }
  0xb3   :  { %v1391_v44 = vsub.f32 %v1344_v6, %v455_v23  ;;  %v1394_v49 = vld [vmem:[#allocation2 + $0x90] sm:$0xff]  ;;  %v296_v23 = vrot.slane %v1397_v53, 1  ;;  %v278_v27 = vrot.slane %v225_v15, 1  ;;  %v375_v28 = vrot.slane %v1268_v11, 2 }
  0xb4   :  { %780 = vrot.lane.b32.xlu0 %v1362_v18, %s1166_s1  ;;  %784 = vrot.lane.b32.xlu1 %v1365_v19, %s1166_s1  ;;  %v456_v0 = vrot.slane %v1394_v49, 6  ;;  %v229_v31 = vmul.f32 2.0, %v1290_v26  ;;  %v1429_v46 = vsub.f32 %v1342_v2, %v453_v3  ;;  %v1432_v24 = vsub.f32 %v1382_v37, %v454_v10 }
  0xb5   :  { %v1434_v12 = vadd.f32 %v379_v13, %v329_v20  ;;  %v381_v32 = vrot.slane %v1290_v26, 2  ;;  %v280_v38 = vsel %vm267_vm4, %v278_v27, %v279_v50  ;;  %v377_v39 = vsel %vm364_vm5, %v375_v28, %v376_v54 }
  0xb6   :  { %v1440_v29 = vsub.f32 %v1394_v49, %v456_v0  ;;  %v328_v3 = vadd.f32 %v280_v38, %v1268_v11  ;;  %v228_v10 = vmul.f32 2.0, %v1288_v25  ;;  %v380_v37 = vrot.slane %v1288_v25, 2 }
  0xb7   :  { %1846 = vst [vmem:[#allocation16_spill] sm:$0xff] %v1434_v12  ;;  %v384_v40 = vsel %vm364_vm5, %v381_v32, %v383_v45  ;;  %v232_v47 = vmul.f32 2.0, %v1315_v42  ;;  %v386_v53 = vrot.slane %v1315_v42, 2  ;;  %v231_v7 = vmul.f32 2.0, %v1313_v41 }
  0xb8   :  { %782 = vrot.lane.b32.xlu0 %v1388_v43, %s1166_s1  ;;  %790 = vrot.lane.b32.xlu1 %v1391_v44, %s1166_s1  ;;  %v1455_v11 = vadd.f32 %v377_v39, %v328_v3  ;;  %v283_v54 = vrot.slane %v228_v10, 1  ;;  %v382_v45 = vsel %vm364_vm5, %v380_v37, %v381_v32  ;;  %v385_v20 = vrot.slane %v1313_v41, 2 }
  0xb9   :  { %v289_v13 = vrot.slane %v232_v47, 1  ;;  %v288_v15 = vrot.slane %v231_v7, 1  ;;  %v601_v37 = vmul.f32 2.0, %v1362_v18 }
  0xba   :  { %1847 = vst [vmem:[#allocation17_spill] sm:$0xff] %v1455_v11  ;;  %v387_v39 = vsel %vm364_vm5, %v385_v20, %v386_v53  ;;  %v1524_v20 = vld [vmem:[#allocation2 + $0xa0] sm:$0x3] }
  0xbb   :  { %v290_v32 = vsel %vm267_vm4, %v288_v15, %v289_v13 }
  0xbc   :  { %786 = vrot.lane.b32.xlu0 %v1418_v14, %s1166_s1  ;;  %644 = vrot.lane.b32.xlu1 %v593_v33, %s1167_s21  ;;  %v284_v33 = vrot.slane %v229_v31, 1  ;;  %v235_v31 = vmul.f32 2.0, %v1344_v6 }
  0xbe   :  { %v287_v30 = vsel %vm267_vm4, %v284_v33, %v286_v56  ;;  %v389_v56 = vsel %vm364_vm5, %v386_v53, %v388_v60  ;;  %v285_v28 = vsel %vm267_vm4, %v283_v54, %v284_v33  ;;  %v332_v33 = vadd.f32 %v290_v32, %v1313_v41 }
  0xbf   :  { %v331_v50 = vadd.f32 %v287_v30, %v1290_v26  ;;  %v330_v38 = vadd.f32 %v285_v28, %v1288_v25  ;;  %v292_v26 = vsel %vm267_vm4, %v289_v13, %v291_v16  ;;  %v294_v3 = vrot.slane %v235_v31, 1  ;;  %v1526_v28 = vld [vmem:[#allocation2 + $0xa8] sm:$0xff] }
  0xc0   :  { %788 = vrot.lane.b32.xlu0 %v1429_v46, %s1166_s1  ;;  %648 = vrot.lane.b32.xlu1 %v595_v36, %s1167_s21  ;;  %v391_v36 = vrot.slane %v1344_v6, 2  ;;  %v333_v60 = vadd.f32 %v292_v26, %v1315_v42  ;;  %v234_v25 = vmul.f32 2.0, %v1342_v2  ;;  %v390_v16 = vrot.slane %v1342_v2, 2 }
  0xc1   :  { %v1461_v27 = vadd.f32 %v384_v40, %v331_v50  ;;  %v1476_v10 = vadd.f32 %v382_v45, %v330_v38  ;;  %v1483_v47 = vadd.f32 %v387_v39, %v332_v33  ;;  %v440_v41 = vsel %vm437_vm3, %v438_v58, %v439_v4  ;;  %v1541_v33 = vld [vmem:[#allocation2 + $0xb0] sm:$0xff] }
  0xc2   :  { %v394_v40 = vsel %vm364_vm5, %v391_v36, %v393_v17  ;;  %v1481_v30 = vadd.f32 %v389_v56, %v333_v60  ;;  %v293_v17 = vrot.slane %v234_v25, 1  ;;  %v392_v53 = vsel %vm364_vm5, %v390_v16, %v391_v36  ;;  %v1519_v56 = vld [vmem:[#allocation2 + $0x98] sm:$0xff] }
  0xc3   :  { %1848 = vst [vmem:[#allocation18_spill] sm:$0xff] %v1461_v27  ;;  %1849 = vst [vmem:[#allocation19_spill] sm:$0xff] %v1476_v10  ;;  %v602_v50 = vmul.f32 2.0, %v1388_v43  ;;  %v1501_v57 = vsub.f32 %v1249_v1, %v440_v41  ;;  %v590_v54 = vmul.f32 2.0, %v1241_v61  ;;  %v605_v1 = vmul.f32 2.0, %v1429_v46 }
  0xc4   :  { %792 = vrot.lane.b32.xlu0 %v1432_v24, %s1166_s1  ;;  %656 = vrot.lane.b32.xlu1 %v599_v63, %s1167_s21  ;;  %1850 = vst [vmem:[#allocation20_spill] sm:$0xff] %v1481_v30  ;;  %1851 = vst [vmem:[#allocation21_spill] sm:$0xff] %v1483_v47  ;;  %v297_v63 = vsel %vm267_vm4, %v294_v3, %v296_v23  ;;  %v295_v23 = vsel %vm267_vm4, %v293_v17, %v294_v3  ;;  %v592_v45 = vmul.f32 2.0, %v1262_v8 }
  0xc5   :  { %v335_v42 = vadd.f32 %v297_v63, %v1344_v6  ;;  %v334_v58 = vadd.f32 %v295_v23, %v1342_v2  ;;  %v604_v6 = vmul.f32 2.0, %v1418_v14  ;;  %v607_v2 = vmul.f32 2.0, %v1432_v24 }
  0xc6   :  { %v596_v13 = vmul.f32 2.0, %v1284_v22  ;;  %v457_v15 = vrot.slane %v1519_v56, 6  ;;  %v598_v31 = vmul.f32 2.0, %v1304_v34  ;;  %v608_v36 = vmul.f32 2.0, %v1440_v29 }
  0xc7   :  { %v1496_v7 = vadd.f32 %v394_v40, %v335_v42  ;;  %v1507_v4 = vadd.f32 %v392_v53, %v334_v58  ;;  %v459_v26 = vrot.slane %v1526_v28, 6  ;;  %v594_v32 = vmul.f32 2.0, %v1281_v21  ;;  %v1546_v40 = vld [vmem:[#allocation2 + $0xb8] sm:$0x3] }
  0xc8   :  { %660 = vrot.lane.b32.xlu1 %v601_v37, %s1167_s21  ;;  %794 = vrot.lane.b32.xlu0 %v1440_v29, %s1166_s1  ;;  %v1531_v38 = vsub.f32 %v1524_v20, %v457_v15  ;;  %v460_v3 = vrot.slane %v1541_v33, 6  ;;  %v600_v37 = vmul.f32 2.0, %v1335_v52  ;;  %v603_v41 = vmul.f32 2.0, %v1365_v19 }
  0xc9   :  { %1852 = vst [vmem:[#allocation22_spill] sm:$0xff] %v1496_v7  ;;  %1853 = vst [vmem:[#allocation23_spill] sm:$0xff] %v1507_v4  ;;  %v1539_v60 = vsub.f32 %v1526_v28, %v459_v26  ;;  %v591_v42 = vmul.f32 2.0, %v1501_v57  ;;  %v458_v17 = vsel %vm437_vm3, %v456_v0, %v457_v15  ;;  %v606_v53 = vmul.f32 2.0, %v1391_v44 }
  0xca   :  { %1854 = vst [vmem:[#allocation24_spill] sm:$0xff] %v1531_v38  ;;  %v610_v39 = vmul.f32 2.0, %v1531_v38  ;;  %v1550_v16 = vsub.f32 %v1546_v40, %v460_v3  ;;  %v597_v23 = vmul.f32 2.0, %v1307_v35  ;;  %v461_v58 = vsel %vm437_vm3, %v459_v26, %v460_v3 }
  0xcb   :  { %1855 = vst [vmem:[#allocation25_spill] sm:$0xff] %v1539_v60  ;;  %v611_v25 = vmul.f32 2.0, %v1539_v60  ;;  %v1576_v0 = vsub.f32 %v1541_v33, %v461_v58  ;;  %v242_v26 = vmul.f32 2.0, %v1546_v40  ;;  %v398_v3 = vrot.slane %v1524_v20, 2 }
  0xcc   :  { %662 = vrot.lane.b32.xlu1 %v602_v50, %s1167_s21  ;;  %760 = vrot.lane.b32.xlu0 %v1501_v57, %s1166_s1  ;;  %1856 = vst [vmem:[#allocation26_spill] sm:$0xff] %v1550_v16  ;;  %v613_v63 = vmul.f32 2.0, %v1550_v16  ;;  %v1569_v50 = vsub.f32 %v1519_v56, %v458_v17 }
  0xcd   :  { %1857 = vst [vmem:[#allocation27_spill] sm:$0xff] %v1576_v0 }
  0xd0   :  { %666 = vrot.lane.b32.xlu1 %v604_v6, %s1167_s21  ;;  %638 = vrot.lane.b32.xlu0 %v590_v54, %s1167_s21  ;;  %v609_v6 = vmul.f32 2.0, %v1569_v50  ;;  %v612_v54 = vmul.f32 2.0, %v1576_v0 }
  0xd4   :  { %668 = vrot.lane.b32.xlu1 %v605_v1, %s1167_s21  ;;  %642 = vrot.lane.b32.xlu0 %v592_v45, %s1167_s21  ;;  %v238_v1 = vmul.f32 2.0, %v1519_v56  ;;  %v239_v45 = vmul.f32 2.0, %v1524_v20 }
  0xd6   :  { %v301_v15 = vrot.slane %v239_v45, 1 }
  0xd8   :  { %672 = vrot.lane.b32.xlu1 %v607_v2, %s1167_s21  ;;  %650 = vrot.lane.b32.xlu0 %v596_v13, %s1167_s21  ;;  %v237_v2 = vmul.f32 2.0, %v1394_v49  ;;  %v299_v13 = vrot.slane %v238_v1, 1  ;;  %v401_v1 = vrot.slane %v1541_v33, 2 }
  0xdc   :  { %654 = vrot.lane.b32.xlu0 %v598_v31, %s1167_s21  ;;  %674 = vrot.lane.b32.xlu1 %v608_v36, %s1167_s21  ;;  %v298_v31 = vrot.slane %v237_v2, 1  ;;  %v241_v36 = vmul.f32 2.0, %v1541_v33  ;;  %v403_v2 = vrot.slane %v1546_v40, 2 }
  0xe0   :  { %646 = vrot.lane.b32.xlu0 %v594_v32, %s1167_s21  ;;  %678 = vrot.lane.b32.xlu1 %v610_v39, %s1167_s21  ;;  %v240_v32 = vmul.f32 2.0, %v1526_v28  ;;  %v396_v39 = vrot.slane %v1519_v56, 2 }
  0xe2   :  { %v303_v17 = vrot.slane %v240_v32, 1  ;;  %v404_v32 = vsel %vm364_vm5, %v401_v1, %v403_v2 }
  0xe4   :  { %798 = vrot.lane.b32.xlu0 %v1531_v38, %s1166_s1  ;;  %680 = vrot.lane.b32.xlu1 %v611_v25, %s1167_s21  ;;  %v302_v25 = vsel %vm267_vm4, %v299_v13, %v301_v15  ;;  %v400_v15 = vrot.slane %v1526_v28, 2 }
  0xe5   :  { %v337_v20 = vadd.f32 %v302_v25, %v1519_v56 }
  0xe8   :  { %658 = vrot.lane.b32.xlu0 %v600_v37, %s1167_s21  ;;  %684 = vrot.lane.b32.xlu1 %v613_v63, %s1167_s21  ;;  %v395_v37 = vrot.slane %v1394_v49, 2  ;;  %v300_v63 = vsel %vm267_vm4, %v298_v31, %v299_v13 }
  0xec   :  { %664 = vrot.lane.b32.xlu0 %v603_v41, %s1167_s21  ;;  %640 = vrot.lane.b32.xlu1 %v591_v42, %s1167_s21  ;;  %v304_v41 = vrot.slane %v241_v36, 1  ;;  %v306_v42 = vrot.slane %v242_v26, 1 }
  0xee   :  { %v307_v45 = vsel %vm267_vm4, %v304_v41, %v306_v42  ;;  %v305_v13 = vsel %vm267_vm4, %v303_v17, %v304_v41 }
  0xef   :  { %v339_v26 = vadd.f32 %v307_v45, %v1541_v33  ;;  %v338_v40 = vadd.f32 %v305_v13, %v1526_v28 }
  0xf0   :  { %670 = vrot.lane.b32.xlu0 %v606_v53, %s1167_s21  ;;  %652 = vrot.lane.b32.xlu1 %v597_v23, %s1167_s21  ;;  %v399_v23 = vsel %vm364_vm5, %v396_v39, %v398_v3 }
  0xf1   :  { %v1637_v31 = vadd.f32 %v399_v23, %v337_v20 }
  0xf3   :  { %1858 = vst [vmem:[#allocation28_spill] sm:$0xff] %v1637_v31 }
  0xf4   :  { %676 = vrot.lane.b32.xlu0 %v609_v6, %s1167_s21  ;;  %796 = vrot.lane.b32.xlu1 %v1569_v50, %s1166_s1  ;;  %v336_v6 = vadd.f32 %v300_v63, %v1394_v49 }
  0xf8   :  { %800 = vrot.lane.b32.xlu1 %v1539_v60, %s1166_s1  ;;  %682 = vrot.lane.b32.xlu0 %v612_v54, %s1167_s21  ;;  %v397_v54 = vsel %vm364_vm5, %v395_v37, %v396_v39  ;;  %v402_v39 = vsel %vm364_vm5, %v400_v15, %v401_v1  ;;  %v1651_v37 = vadd.f32 %v404_v32, %v339_v26 }
  0xf9   :  { %v1639_v36 = vadd.f32 %v397_v54, %v336_v6  ;;  %v1653_v63 = vadd.f32 %v402_v39, %v338_v40 }
  0xfa   :  { %1860 = vst [vmem:[#allocation30_spill] sm:$0xff] %v1651_v37 }
  0xfb   :  { %1859 = vst [vmem:[#allocation29_spill] sm:$0xff] %v1639_v36  ;;  %1861 = vst [vmem:[#allocation31_spill] sm:$0xff] %v1653_v63 }
  0xfc   :  { %804 = vrot.lane.b32.xlu1 %v1550_v16, %s1166_s1  ;;  %802 = vrot.lane.b32.xlu0 %v1576_v0, %s1166_s1 }
 0x100   :  { %528 = vrot.lane.b32.xlu1 %v1327_v48, %s1168_s22  ;;  %526 = vrot.lane.b32.xlu0 %v1347_v9, %s1168_s22 }
 0x104   :  { %532 = vrot.lane.b32.xlu1 %v1399_v55, %s1168_s22  ;;  %530 = vrot.lane.b32.xlu0 %v1401_v62, %s1168_s22 }
 0x108   :  { %536 = vrot.lane.b32.xlu1 %v1434_v12, %s1168_s22  ;;  %534 = vrot.lane.b32.xlu0 %v1455_v11, %s1168_s22 }
 0x10c   :  { %540 = vrot.lane.b32.xlu1 %v1461_v27, %s1168_s22  ;;  %538 = vrot.lane.b32.xlu0 %v1476_v10, %s1168_s22 }
 0x110   :  { %544 = vrot.lane.b32.xlu1 %v1481_v30, %s1168_s22  ;;  %542 = vrot.lane.b32.xlu0 %v1483_v47, %s1168_s22 }
 0x111   :  { %v765_v53 = vpop.permute.xlu0 %764 }
 0x112   :  { %v1621_v58 = vpop.permute.xlu1 %758 }
 0x114   :  { %548 = vrot.lane.b32.xlu1 %v1496_v7, %s1168_s22  ;;  %546 = vrot.lane.b32.xlu0 %v1507_v4, %s1168_s22 }
 0x115   :  { %v769_v56 = vpop.permute.xlu0 %768 }
 0x116   :  { %v1635_v49 = vpop.permute.xlu1 %762 }
 0x118   :  { %552 = vrot.lane.b32.xlu1 %v1637_v31, %s1168_s22  ;;  %550 = vrot.lane.b32.xlu0 %v1639_v36, %s1168_s22 }
 0x11a   :  { %v767_v3 = vpop.permute.xlu1 %766  ;;  %v1649_v25 = vpop.permute.xlu0 %770 }
 0x11c   :  { %556 = vrot.lane.b32.xlu1 %v1651_v37, %s1168_s22  ;;  %554 = vrot.lane.b32.xlu0 %v1653_v63, %s1168_s22 }
 0x11e   :  { %v1659_v28 = vpop.permute.xlu1 %772  ;;  %v1661_v33 = vpop.permute.xlu0 %774 }
 0x122   :  { %v1663_v41 = vpop.permute.xlu1 %778  ;;  %v1665_v42 = vpop.permute.xlu0 %776 }
 0x126   :  { %v1667_v17 = vpop.permute.xlu1 %784  ;;  %v1669_v23 = vpop.permute.xlu0 %780 }
 0x12a   :  { %v1671_v20 = vpop.permute.xlu1 %790  ;;  %v1673_v6 = vpop.permute.xlu0 %782 }
 0x12e   :  { %v645_v54 = vpop.permute.xlu1 %644  ;;  %v1675_v1 = vpop.permute.xlu0 %786 }
 0x12f   :  { %v713_v30 = vadd.f32 %v645_v54, %v1236_v59 }
 0x131   :  { %v833_v48 = vadd.f32 %v765_v53, %v713_v30 }
 0x132   :  { %v649_v45 = vpop.permute.xlu1 %648  ;;  %v1677_v2 = vpop.permute.xlu0 %788 }
 0x133   :  { %v715_v47 = vadd.f32 %v649_v45, %v1258_v5  ;;  %v873_v60 = vmul.f32 %v833_v48, %v833_v48 }
 0x135   :  { %v835_v12 = vadd.f32 %v769_v56, %v715_v47  ;;  %v923_v38 = vrot.slane %v873_v60, 2 }
 0x136   :  { %v657_v13 = vpop.permute.xlu1 %656  ;;  %v1679_v15 = vpop.permute.xlu0 %792 }
 0x137   :  { %v875_v62 = vmul.f32 %v835_v12, %v835_v12 }
 0x139   :  { %v926_v45 = vrot.slane %v875_v62, 2 }
 0x13a   :  { %v661_v26 = vpop.permute.xlu1 %660  ;;  %v1681_v40 = vpop.permute.xlu0 %794 }
 0x13b   :  { %1862 = vst [vmem:[#allocation32_spill] sm:$0xff] %v1681_v40 }
 0x13e   :  { %v663_v32 = vpop.permute.xlu1 %662  ;;  %v761_v39 = vpop.permute.xlu0 %760 }
 0x142   :  { %v667_v37 = vpop.permute.xlu1 %666  ;;  %v639_v63 = vpop.permute.xlu0 %638 }
 0x143   :  { %v710_v59 = vadd.f32 %v639_v63, %v1241_v61 }
 0x145   :  { %v830_v48 = vadd.f32 %v1621_v58, %v710_v59 }
 0x146   :  { %v1683_v36 = vpop.permute.xlu1 %668  ;;  %v643_v31 = vpop.permute.xlu0 %642 }
 0x147   :  { %v712_v30 = vadd.f32 %v643_v31, %v1262_v8  ;;  %v870_v61 = vmul.f32 %v830_v48, %v830_v48 }
 0x14a   :  { %v1685_v4 = vpop.permute.xlu1 %672  ;;  %v651_v7 = vpop.permute.xlu0 %650 }
 0x14b   :  { %v716_v60 = vadd.f32 %v651_v7, %v1284_v22  ;;  %v721_v22 = vadd.f32 %v661_v26, %v1362_v18  ;;  %v724_v18 = vadd.f32 %v667_v37, %v1418_v14  ;;  %v725_v37 = vadd.f32 %v1683_v36, %v1429_v46 }
 0x14d   :  { %v836_v59 = vadd.f32 %v1649_v25, %v716_v60  ;;  %v844_v14 = vadd.f32 %v1675_v1, %v724_v18 }
 0x14e   :  { %v1689_v27 = vpop.permute.xlu1 %674  ;;  %v655_v10 = vpop.permute.xlu0 %654 }
 0x14f   :  { %v718_v31 = vadd.f32 %v655_v10, %v1304_v34  ;;  %v876_v26 = vmul.f32 %v836_v59, %v836_v59  ;;  %v1865_v59 = vld [vmem:[#allocation27_spill] sm:$0xff] }
 0x151   :  { %v838_v34 = vadd.f32 %v1661_v33, %v718_v31 }
 0x152   :  { %v1691_v11 = vpop.permute.xlu1 %678  ;;  %v647_v55 = vpop.permute.xlu0 %646 }
 0x153   :  { %v714_v9 = vadd.f32 %v647_v55, %v1281_v21  ;;  %v832_v55 = vadd.f32 %v1635_v49, %v712_v30  ;;  %v719_v49 = vadd.f32 %v657_v13, %v1332_v51  ;;  %v722_v51 = vadd.f32 %v663_v32, %v1388_v43 }
 0x155   :  { %v834_v16 = vadd.f32 %v767_v3, %v714_v9  ;;  %v872_v8 = vmul.f32 %v832_v55, %v832_v55  ;;  %v842_v48 = vadd.f32 %v1673_v6, %v722_v51  ;;  %v928_v55 = vrot.slane %v876_v26, 2 }
 0x156   :  { %v1694_v0 = vpop.permute.xlu1 %680  ;;  %v1696_v40 = vpop.permute.xlu0 %798 }
 0x157   :  { %v874_v5 = vmul.f32 %v834_v16, %v834_v16  ;;  %v921_v7 = vrot.slane %v872_v8, 2  ;;  %v882_v60 = vmul.f32 %v842_v48, %v842_v48 }
 0x159   :  { %v924_v54 = vrot.slane %v874_v5, 2 }
 0x15a   :  { %v1700_v47 = vpop.permute.xlu1 %684  ;;  %v659_v53 = vpop.permute.xlu0 %658 }
 0x15b   :  { %v927_v21 = vsel %vm364_vm5, %v924_v54, %v926_v45  ;;  %v925_v9 = vsel %vm364_vm5, %v923_v38, %v924_v54  ;;  %v720_v3 = vadd.f32 %v659_v53, %v1335_v52  ;;  %v918_v45 = vrot.slane %v870_v61, 2 }
 0x15d   :  { %v840_v52 = vadd.f32 %v1663_v41, %v720_v3  ;;  %v878_v41 = vmul.f32 %v838_v34, %v838_v34  ;;  %v1867_v34 = vld [vmem:[#allocation26_spill] sm:$0xff] }
 0x15e   :  { %v641_v12 = vpop.permute.xlu1 %640  ;;  %v665_v16 = vpop.permute.xlu0 %664 }
 0x15f   :  { %v711_v62 = vadd.f32 %v641_v12, %v1501_v57  ;;  %v723_v10 = vadd.f32 %v665_v16, %v1365_v19  ;;  %v841_v19 = vadd.f32 %v1669_v23, %v721_v22  ;;  %v880_v30 = vmul.f32 %v840_v52, %v840_v52  ;;  %v1866_v22 = vld [vmem:[#allocation25_spill] sm:$0xff] }
 0x160   :  { %v931_v12 = vrot.slane %v878_v41, 2  ;;  %v733_v52 = vadd.f32 %v1700_v47, %v1867_v34 }
 0x161   :  { %v831_v56 = vadd.f32 %v761_v39, %v711_v62  ;;  %v843_v53 = vadd.f32 %v1667_v17, %v723_v10  ;;  %v881_v23 = vmul.f32 %v841_v19, %v841_v19  ;;  %v727_v17 = vadd.f32 %v1685_v4, %v1432_v24 }
 0x162   :  { %v653_v63 = vpop.permute.xlu1 %652  ;;  %v671_v5 = vpop.permute.xlu0 %670  ;;  %v934_v16 = vrot.slane %v880_v30, 2  ;;  %v845_v24 = vadd.f32 %v1677_v2, %v725_v37  ;;  %v728_v4 = vadd.f32 %v1689_v27, %v1440_v29 }
 0x163   :  { %v871_v38 = vmul.f32 %v831_v56, %v831_v56  ;;  %v717_v58 = vadd.f32 %v653_v63, %v1307_v35  ;;  %v726_v32 = vadd.f32 %v671_v5, %v1391_v44  ;;  %v883_v62 = vmul.f32 %v843_v53, %v843_v53  ;;  %v1863_v5 = vld [vmem:[#allocation24_spill] sm:$0xff] }
 0x164   :  { %v938_v63 = vrot.slane %v882_v60, 2  ;;  %v885_v27 = vmul.f32 %v845_v24, %v845_v24 }
 0x165   :  { %v919_v57 = vrot.slane %v871_v38, 2  ;;  %v837_v54 = vadd.f32 %v1659_v28, %v717_v58  ;;  %v839_v28 = vadd.f32 %v1665_v42, %v719_v49  ;;  %v846_v6 = vadd.f32 %v1671_v20, %v726_v32  ;;  %v1864_v49 = vld [vmem:[#allocation32_spill] sm:$0xff] }
 0x166   :  { %v677_v13 = vpop.permute.xlu0 %676  ;;  %v797_v33 = vpop.permute.xlu1 %796  ;;  %v936_v20 = vrot.slane %v881_v23, 2  ;;  %v939_v56 = vrot.slane %v883_v62, 2  ;;  %v730_v38 = vadd.f32 %v1691_v11, %v1863_v5 }
 0x167   :  { %v877_v39 = vmul.f32 %v837_v54, %v837_v54  ;;  %v920_v35 = vsel %vm364_vm5, %v918_v45, %v919_v57  ;;  %v922_v25 = vsel %vm364_vm5, %v919_v57, %v921_v7  ;;  %v879_v42 = vmul.f32 %v839_v28, %v839_v28 }
 0x168   :  { %958 = vrot.lane.b32.xlu0 %v920_v35, %s1168_s22  ;;  %960 = vrot.lane.b32.xlu1 %v922_v25, %s1168_s22  ;;  %v886_v8 = vmul.f32 %v846_v6, %v846_v6  ;;  %v937_v2 = vsel %vm364_vm5, %v934_v16, %v936_v20  ;;  %v848_v45 = vadd.f32 %v1864_v49, %v728_v4  ;;  %v943_v28 = vrot.slane %v885_v27, 2  ;;  %v1871_v49 = vld [vmem:[#allocation17_spill] sm:$0xff] }
 0x169   :  { %v929_v43 = vrot.slane %v877_v39, 2  ;;  %v933_v36 = vrot.slane %v879_v42, 2  ;;  %v731_v7 = vadd.f32 %v1694_v0, %v1866_v22  ;;  %v850_v11 = vadd.f32 %v1696_v40, %v730_v38  ;;  %v1869_v38 = vld [vmem:[#allocation13_spill] sm:$0xff] }
 0x16a   :  { %v683_v44 = vpop.permute.xlu0 %682  ;;  %v801_v61 = vpop.permute.xlu1 %800  ;;  %v944_v10 = vrot.slane %v886_v8, 2  ;;  %v940_v51 = vsel %vm364_vm5, %v938_v63, %v939_v56  ;;  %v888_v18 = vmul.f32 %v848_v45, %v848_v45  ;;  %v1868_v63 = vld [vmem:[#allocation15_spill] sm:$0xff] }
 0x16b   :  { %v930_v1 = vsel %vm364_vm5, %v928_v55, %v929_v43  ;;  %v932_v46 = vsel %vm364_vm5, %v929_v43, %v931_v12  ;;  %v935_v3 = vsel %vm364_vm5, %v933_v36, %v934_v16  ;;  %v851_v26 = vadd.f32 %v801_v61, %v731_v7 }
 0x16c   :  { %962 = vrot.lane.b32.xlu0 %v925_v9, %s1168_s22  ;;  %964 = vrot.lane.b32.xlu1 %v927_v21, %s1168_s22  ;;  %v729_v9 = vadd.f32 %v677_v13, %v1569_v50  ;;  %v884_v21 = vmul.f32 %v844_v14, %v844_v14  ;;  %v847_v50 = vadd.f32 %v1679_v15, %v727_v17  ;;  %v948_v53 = vrot.slane %v888_v18, 2  ;;  %v1877_v18 = vld [vmem:[#allocation21_spill] sm:$0xff] }
 0x16d   :  { %v732_v15 = vadd.f32 %v683_v44, %v1865_v59  ;;  %v890_v40 = vmul.f32 %v850_v11, %v850_v11  ;;  %v945_v47 = vsel %vm364_vm5, %v943_v28, %v944_v10  ;;  %v891_v43 = vmul.f32 %v851_v26, %v851_v26  ;;  %v1874_v11 = vld [vmem:[#allocation19_spill] sm:$0xff] }
 0x16e   :  { %v849_v31 = vadd.f32 %v797_v33, %v729_v9  ;;  %v803_v58 = vpop.permute.xlu0 %802  ;;  %v941_v29 = vrot.slane %v884_v21, 2  ;;  %v805_v57 = vpop.permute.xlu1 %804  ;;  %v887_v54 = vmul.f32 %v847_v50, %v847_v50 }
 0x16f   :  { %v852_v35 = vadd.f32 %v803_v58, %v732_v15  ;;  %v853_v13 = vadd.f32 %v805_v57, %v733_v52  ;;  %v951_v32 = vrot.slane %v890_v40, 2  ;;  %v953_v55 = vrot.slane %v891_v43, 2  ;;  %v1872_v15 = vld [vmem:[#allocation12_spill] sm:$0xff] }
 0x170   :  { %966 = vrot.lane.b32.xlu0 %v930_v1, %s1168_s22  ;;  %968 = vrot.lane.b32.xlu1 %v932_v46, %s1168_s22  ;;  %v889_v39 = vmul.f32 %v849_v31, %v849_v31  ;;  %v942_v25 = vsel %vm364_vm5, %v939_v56, %v941_v29  ;;  %v946_v0 = vrot.slane %v887_v54, 2  ;;  %v1873_v54 = vld [vmem:[#allocation16_spill] sm:$0xff] }
 0x171   :  { %v892_v19 = vmul.f32 %v852_v35, %v852_v35  ;;  %v893_v41 = vmul.f32 %v853_v13, %v853_v13 }
 0x172   :  { %v949_v33 = vrot.slane %v889_v39, 2  ;;  %v947_v30 = vsel %vm364_vm5, %v944_v10, %v946_v0  ;;  %v527_v12 = vpop.permute.xlu0 %526  ;;  %v529_v16 = vpop.permute.xlu1 %528  ;;  %v1875_v39 = vld [vmem:[#allocation18_spill] sm:$0xff] }
 0x173   :  { %v954_v48 = vrot.slane %v892_v19, 2  ;;  %v956_v14 = vrot.slane %v893_v41, 2  ;;  %v574_v58 = vsub.f32 %v1869_v38, %v527_v12  ;;  %v575_v57 = vsub.f32 %v1872_v15, %v529_v16  ;;  %v1878_v0 = vld [vmem:[#allocation22_spill] sm:$0xff]  ;;  %v1882_v15 = vld [vmem:[#allocation31_spill] sm:$0xff] }
 0x174   :  { %970 = vrot.lane.b32.xlu0 %v935_v3, %s1168_s22  ;;  %972 = vrot.lane.b32.xlu1 %v937_v2, %s1168_s22  ;;  %v950_v42 = vsel %vm364_vm5, %v948_v53, %v949_v33  ;;  %v952_v37 = vsel %vm364_vm5, %v949_v33, %v951_v32  ;;  %v1870_v2 = vld [vmem:[#allocation14_spill] sm:$0xff] }
 0x175   :  { %v955_v23 = vsel %vm364_vm5, %v953_v55, %v954_v48  ;;  %v957_v17 = vsel %vm364_vm5, %v954_v48, %v956_v14  ;;  %v854_v52 = vmul.f32 %v574_v58, %v574_v58 }
 0x176   :  { %v531_v44 = vpop.permute.xlu0 %530  ;;  %v533_v62 = vpop.permute.xlu1 %532 }
 0x177   :  { %v576_v5 = vsub.f32 %v1868_v63, %v531_v44  ;;  %v577_v29 = vsub.f32 %v1870_v2, %v533_v62 }
 0x178   :  { %974 = vrot.lane.b32.xlu0 %v940_v51, %s1168_s22  ;;  %976 = vrot.lane.b32.xlu1 %v942_v25, %s1168_s22  ;;  %v1876_v51 = vld [vmem:[#allocation20_spill] sm:$0xff] }
 0x179   :  { %v856_v7 = vmul.f32 %v576_v5, %v576_v5  ;;  %v857_v10 = vmul.f32 %v577_v29, %v577_v29 }
 0x17a   :  { %v535_v6 = vpop.permute.xlu0 %534  ;;  %v537_v9 = vpop.permute.xlu1 %536 }
 0x17b   :  { %v578_v45 = vsub.f32 %v1871_v49, %v535_v6  ;;  %v579_v22 = vsub.f32 %v1873_v54, %v537_v9 }
 0x17c   :  { %978 = vrot.lane.b32.xlu0 %v945_v47, %s1168_s22  ;;  %980 = vrot.lane.b32.xlu1 %v947_v30, %s1168_s22  ;;  %v855_v47 = vmul.f32 %v575_v57, %v575_v57  ;;  %v1879_v30 = vld [vmem:[#allocation23_spill] sm:$0xff] }
 0x17d   :  { %v858_v28 = vmul.f32 %v578_v45, %v578_v45  ;;  %v859_v41 = vmul.f32 %v579_v22, %v579_v22 }
 0x17e   :  { %v539_v61 = vpop.permute.xlu0 %538  ;;  %v541_v1 = vpop.permute.xlu1 %540 }
 0x17f   :  { %v580_v34 = vsub.f32 %v1874_v11, %v539_v61  ;;  %v581_v35 = vsub.f32 %v1875_v39, %v541_v1  ;;  %v1880_v61 = vld [vmem:[#allocation28_spill] sm:$0xff]  ;;  %v1883_v11 = vld [vmem:[#allocation30_spill] sm:$0xff] }
 0x180   :  { %982 = vrot.lane.b32.xlu0 %v950_v42, %s1168_s22  ;;  %984 = vrot.lane.b32.xlu1 %v952_v37, %s1168_s22 }
 0x181   :  { %v860_v32 = vmul.f32 %v580_v34, %v580_v34  ;;  %v861_v14 = vmul.f32 %v581_v35, %v581_v35 }
 0x182   :  { %v543_v60 = vpop.permute.xlu0 %542  ;;  %v545_v46 = vpop.permute.xlu1 %544 }
 0x183   :  { %v583_v13 = vsub.f32 %v1876_v51, %v545_v46  ;;  %v582_v26 = vsub.f32 %v1877_v18, %v543_v60 }
 0x184   :  { %986 = vrot.lane.b32.xlu0 %v955_v23, %s1168_s22  ;;  %988 = vrot.lane.b32.xlu1 %v957_v17, %s1168_s22 }
 0x185   :  { %v863_v37 = vmul.f32 %v583_v13, %v583_v13  ;;  %v862_v12 = vmul.f32 %v582_v26, %v582_v26 }
 0x186   :  { %v547_v36 = vpop.permute.xlu0 %546  ;;  %v549_v21 = vpop.permute.xlu1 %548 }
 0x187   :  { %v585_v40 = vsub.f32 %v1878_v0, %v549_v21  ;;  %v584_v53 = vsub.f32 %v1879_v30, %v547_v36  ;;  %v1881_v36 = vld [vmem:[#allocation29_spill] sm:$0xff] }
 0x189   :  { %v865_v16 = vmul.f32 %v585_v40, %v585_v40  ;;  %v864_v9 = vmul.f32 %v584_v53, %v584_v53 }
 0x18a   :  { %v551_v24 = vpop.permute.xlu0 %550  ;;  %v553_v4 = vpop.permute.xlu1 %552 }
 0x18b   :  { %v587_v1 = vsub.f32 %v1880_v61, %v553_v4  ;;  %v586_v21 = vsub.f32 %v1881_v36, %v551_v24 }
 0x18e   :  { %v1775_v20 = vpop.permute.xlu0 %554  ;;  %v1777_v50 = vpop.permute.xlu1 %556 }
 0x18f   :  { %v588_v57 = vsub.f32 %v1882_v15, %v1775_v20  ;;  %v589_v34 = vsub.f32 %v1883_v11, %v1777_v50 }
 0x191   :  { %v868_v26 = vmul.f32 %v588_v57, %v588_v57 }
 0x1da   :  { %v959_v56 = vpop.permute.xlu0 %958  ;;  %v961_v8 = vpop.permute.xlu1 %960 }
 0x1db   :  { %v1006_v48 = vadd.f32 %v959_v56, %v854_v52  ;;  %v1007_v55 = vadd.f32 %v961_v8, %v855_v47 }
 0x1dd   :  { %v1023_v56 = vsel %vm1022_vm6, %v1006_v48, 0.0 }
 0x1de   :  { %v963_v31 = vpop.permute.xlu0 %962  ;;  %v965_v3 = vpop.permute.xlu1 %964 }
 0x1df   :  { %v1008_v33 = vadd.f32 %v963_v31, %v856_v7  ;;  %v1009_v43 = vadd.f32 %v965_v3, %v857_v10  ;;  %v1038_v3 = vsel %vm1022_vm6, %v1007_v55, 0.0  ;;  %v867_v7 = vmul.f32 %v587_v1, %v587_v1 }
 0x1e1   :  { %v1024_v44 = vsel %vm1022_vm6, %v1008_v33, 0.0  ;;  %v1039_v60 = vsel %vm1022_vm6, %v1009_v43, 0.0  ;;  %v869_v33 = vmul.f32 %v589_v34, %v589_v34 }
 0x1e2   :  { %v967_v27 = vpop.permute.xlu0 %966  ;;  %v969_v59 = vpop.permute.xlu1 %968  ;;  %v1025_v63 = vadd.f32 %v1024_v44, %v1023_v56  ;;  %v1040_v2 = vadd.f32 %v1039_v60, %v1038_v3 }
 0x1e3   :  { %v1010_v42 = vadd.f32 %v967_v27, %v858_v28  ;;  %v1011_v23 = vadd.f32 %v969_v59, %v859_v41  ;;  %v866_v59 = vmul.f32 %v586_v21, %v586_v21 }
 0x1e5   :  { %v1026_v8 = vsel %vm1022_vm6, %v1010_v42, 0.0  ;;  %v1041_v5 = vsel %vm1022_vm6, %v1011_v23, 0.0 }
 0x1e6   :  { %v971_v25 = vpop.permute.xlu0 %970  ;;  %v973_v19 = vpop.permute.xlu1 %972  ;;  %v1027_v49 = vadd.f32 %v1026_v8, %v1025_v63  ;;  %v1042_v54 = vadd.f32 %v1041_v5, %v1040_v2 }
 0x1e7   :  { %v1012_v62 = vadd.f32 %v971_v25, %v860_v32  ;;  %v1013_v46 = vadd.f32 %v973_v19, %v861_v14 }
 0x1e9   :  { %v1028_v4 = vsel %vm1022_vm6, %v1012_v62, 0.0  ;;  %v1043_v24 = vsel %vm1022_vm6, %v1013_v46, 0.0 }
 0x1ea   :  { %v975_v17 = vpop.permute.xlu0 %974  ;;  %v977_v6 = vpop.permute.xlu1 %976  ;;  %v1029_v52 = vadd.f32 %v1028_v4, %v1027_v49  ;;  %v1044_v35 = vadd.f32 %v1043_v24, %v1042_v54 }
 0x1eb   :  { %v1014_v31 = vadd.f32 %v975_v17, %v862_v12  ;;  %v1015_v38 = vadd.f32 %v977_v6, %v863_v37 }
 0x1ed   :  { %v1030_v22 = vsel %vm1022_vm6, %v1014_v31, 0.0  ;;  %v1045_v10 = vsel %vm1022_vm6, %v1015_v38, 0.0 }
 0x1ee   :  { %v979_v58 = vpop.permute.xlu0 %978  ;;  %v981_v29 = vpop.permute.xlu1 %980  ;;  %v1031_v28 = vadd.f32 %v1030_v22, %v1029_v52  ;;  %v1046_v0 = vadd.f32 %v1045_v10, %v1044_v35 }
 0x1ef   :  { %v1016_v27 = vadd.f32 %v979_v58, %v864_v9  ;;  %v1017_v45 = vadd.f32 %v981_v29, %v865_v16 }
 0x1f1   :  { %v1032_v51 = vsel %vm1022_vm6, %v1016_v27, 0.0  ;;  %v1047_v18 = vsel %vm1022_vm6, %v1017_v45, 0.0 }
 0x1f2   :  { %v983_v39 = vpop.permute.xlu0 %982  ;;  %v985_v13 = vpop.permute.xlu1 %984  ;;  %v1033_v19 = vadd.f32 %v1032_v51, %v1031_v28  ;;  %v1048_v41 = vadd.f32 %v1047_v18, %v1046_v0 }
 0x1f3   :  { %v1018_v25 = vadd.f32 %v983_v39, %v866_v59  ;;  %v1019_v20 = vadd.f32 %v985_v13, %v867_v7 }
 0x1f5   :  { %v1034_v40 = vsel %vm1022_vm6, %v1018_v25, 0.0  ;;  %v1049_v50 = vsel %vm1022_vm6, %v1019_v20, 0.0 }
 0x1f6   :  { %v987_v47 = vpop.permute.xlu0 %986  ;;  %v989_v30 = vpop.permute.xlu1 %988  ;;  %v1035_v43 = vadd.f32 %v1034_v40, %v1033_v19  ;;  %v1050_v48 = vadd.f32 %v1049_v50, %v1048_v41 }
 0x1f7   :  { %v1020_v53 = vadd.f32 %v987_v47, %v868_v26  ;;  %v1021_v32 = vadd.f32 %v989_v30, %v869_v33 }
 0x1f9   :  { %v1036_v42 = vsel %vm1022_vm6, %v1020_v53, 0.0  ;;  %v1051_v14 = vsel %vm1022_vm6, %v1021_v32, 0.0 }
 0x1fa   :  { %v1037_v37 = vadd.f32 %v1036_v42, %v1035_v43  ;;  %v1052_v55 = vadd.f32 %v1051_v14, %v1050_v48 }
 0x1fc   :  { %v1053_v23 = vsel %vm1022_vm6, %v1037_v37, 0.0  ;;  %v1054_v17 = vsel %vm1022_vm6, %v1052_v55, 0.0 }
 0x1fd   :  { %v1055_v12 = vadd.f32 %v1054_v17, %v1053_v23 }
 0x1ff   :  { %v1056_v16 = vrot.slane %v1055_v12, 4 }
 0x201   :  { %v1057_v44 = vadd.f32 %v1056_v16, %v1055_v12 }
 0x203   :  { %v1058_v62 = vrot.slane %v1057_v44, 2 }
 0x205   :  { %v1059_v6 = vadd.f32 %v1058_v62, %v1057_v44 }
 0x207   :  { %v1060_v9 = vrot.slane %v1059_v6, 1 }
 0x209   :  { %v1061_v61 = vadd.f32 %v1060_v9, %v1059_v6 }
 0x20b   :  { %1063 = vrot.lane.b32.xlu0 %v1061_v61, %s1166_s1 }
 0x27d   :  { %v1064_v1 = vpop.permute.xlu0 %1063 }
 0x27e   :  { %1067 = vst.msk [vmem:[#allocation8] sm:$0x1] %vm1066_vm7, %v1064_v1 }
 0x27f   :  { %1145 = shalt.err (!%p1142_p0)
}
 0x280   :  { %1077 = dma.vmem_to_hbm [thread:$0]  %s1075_s24, 16, %s1821_s2, [#allocation5]  }
 0x281   :  { %1158 = dma.done.wait [#allocation5], 16  }
 0x282   :  { %1159 = vsyncadd [#allocation5], 4294967280 }
 0x283   :  { %1081 = vsyncpa [#allocation4], 1 }
 0x284   :  { %1082 = vsyncpa [#allocation7], 1 }
 0x285   :  { %1083 = vsyncpa [#allocation5], 1 }

</bundles_post_ra>
